<compile_context>
chip_gen: v7x
topology: tpu7x:2x2x1
jax: 0.10.0
libtpu: 0.0.40
codegen_flags: <defaults>
</compile_context>

<pallas_src>
import functools

import numpy as np
import jax
import jax.numpy as jnp
from jax import lax
from jax.experimental import pallas as pl
from jax.experimental.pallas import tpu as pltpu


def _video_mask_kernel(w_ref, in_mask_hbm, out_mask_hbm, loss_ref,
                       att_scratch, dma_sem, *,
                       vid_len: int, seq_len: int, soft2hard: bool):
    """Grid = (B,).  Program b splices the (once-computed) learned video-attention
    block into attention_mask[b, -L:, -L:] via a corner-only HBM DMA."""
    del in_mask_hbm  # aliased to out_mask_hbm; untouched regions are preserved by aliasing
    L, S = vid_len, seq_len
    b = pl.program_id(0)

    # --- compute learn_att and sparsity loss exactly once (batch-independent) ------
    @pl.when(b == 0)
    def _():
        sig = jax.nn.sigmoid(w_ref[...])                         # EUP
        row = lax.broadcasted_iota(jnp.int32, (L, L), 0)
        col = lax.broadcasted_iota(jnp.int32, (L, L), 1)
        diag = (row == col).astype(jnp.float32)                  # torch.diag(torch.ones(L))
        video_attention = (1.0 - diag) * sig
        learn_att = diag + video_attention
        if soft2hard:
            learn_att = (learn_att >= 0.5).astype(jnp.float32)
        att_scratch[...] = learn_att                             # persists across grid steps
        loss_ref[0, 0] = jnp.mean(jnp.abs(video_attention))      # scalar -> SMEM output

    # --- attention_mask[b, -L:, -L:] = learn_att  (write only the corner) ----------
    cp = pltpu.make_async_copy(
        att_scratch,
        out_mask_hbm.at[b, pl.ds(S - L, L), pl.ds(S - L, L)],
        dma_sem)
    cp.start()
    cp.wait()


def video_transformer_forward(attention_mask, learn_vid_att_weight, *,
                              max_img_seq_length: int,
                              sparse_mask_soft2hard: bool = False):
    """Returns (updated_attention_mask, loss_sparsity).

    attention_mask:       (B, S, S)  any dtype (cast to float32 like `.float()`)
    learn_vid_att_weight: (L*L, 1)   nn.Embedding(L*L, 1).weight
    """
    B, S, S2 = attention_mask.shape
    assert S == S2
    L = int(max_img_seq_length)
    assert S >= L

    w2d = learn_vid_att_weight.reshape(L, L).astype(jnp.float32)
    # attention_mask.float(): only materialize a cast pass when the dtype differs;
    # in the float32 case the buffer is aliased straight through with no extra traffic.
    if attention_mask.dtype != jnp.float32:
        attention_mask = attention_mask.astype(jnp.float32)

    kernel = functools.partial(_video_mask_kernel, vid_len=L, seq_len=S,
                               soft2hard=sparse_mask_soft2hard)

    out_mask, loss = pl.pallas_call(
        kernel,
        out_shape=(jax.ShapeDtypeStruct((B, S, S), jnp.float32),
                   jax.ShapeDtypeStruct((1, 1), jnp.float32)),
        grid_spec=pltpu.PrefetchScalarGridSpec(
            num_scalar_prefetch=0,
            grid=(B,),
            in_specs=[
                # constant block index -> the learned-weight tile is DMA'd into VMEM once
                pl.BlockSpec((L, L), lambda b: (0, 0)),
                # full mask stays in HBM, no automatic tile DMA (aliased to output 0)
                pl.BlockSpec(memory_space=pl.ANY),
            ],
            out_specs=[
                pl.BlockSpec(memory_space=pl.ANY),                    # written via corner DMA only
                pl.BlockSpec(memory_space=pltpu.MemorySpace.SMEM),    # scalar sparsity loss
            ],
            scratch_shapes=[
                pltpu.VMEM((L, L), jnp.float32),   # learn_att, persists across the grid
                pltpu.SemaphoreType.DMA(()),
            ],
        ),
        # mask input (index 1) IS the mask output (index 0): in-place corner update,
        # no full (B, S, S) read/write pass through VMEM.
        input_output_aliases={1: 0},
        compiler_params=pltpu.CompilerParams(
            dimension_semantics=("arbitrary",)),
    )(w2d, attention_mask)

    return out_mask, loss[0, 0]


def _reference(attention_mask, learn_vid_att_weight, L, soft2hard=False):
    """Pure-JAX reference mirroring the PyTorch forward."""
    sig = jax.nn.sigmoid(learn_vid_att_weight.reshape(L, L).astype(jnp.float32))
    diag = jnp.eye(L, dtype=jnp.float32)
    video_attention = (1.0 - diag) * sig
    learn_att = diag + video_attention
    if soft2hard:
        learn_att = (learn_att >= 0.5).astype(jnp.float32)
    m = attention_mask.astype(jnp.float32)
    m = m.at[:, -L:, -L:].set(learn_att)
    return m, jnp.mean(jnp.abs(video_attention))


if __name__ == "__main__":
    key = jax.random.PRNGKey(0)
    k_mask, k_w = jax.random.split(key)

    B = 2        # batch
    L = 128      # max_img_seq_length (video tokens)
    T = 128      # text tokens
    S = T + L    # total sequence length

    # attention_mask: 0/1 mask over the full sequence (B, S, S)
    attention_mask = jax.random.bernoulli(
        k_mask, p=0.7, shape=(B, S, S)).astype(jnp.float32)
    # nn.Embedding(L*L, 1).weight ~ N(0, 1), deterministic init
    learn_vid_att_weight = jax.random.normal(k_w, (L * L, 1), dtype=jnp.float32)

    # Compute the pure-JAX reference first (the kernel may update the mask buffer
    # in place when input/output aliasing allows donation).
    ref_mask, ref_loss = _reference(attention_mask, learn_vid_att_weight, L)
    ref_mask, ref_loss = jax.block_until_ready((ref_mask, ref_loss))

    out_mask, loss_sparsity = video_transformer_forward(
        attention_mask, learn_vid_att_weight,
        max_img_seq_length=L, sparse_mask_soft2hard=False)
    out_mask = jax.block_until_ready(out_mask)
    loss_sparsity = jax.block_until_ready(loss_sparsity)

    np.testing.assert_allclose(np.asarray(out_mask), np.asarray(ref_mask),
                               rtol=1e-5, atol=1e-5)
    np.testing.assert_allclose(float(loss_sparsity), float(ref_loss),
                               rtol=1e-5, atol=1e-6)

    print("KERNEL_OK")
</pallas_src>

<mosaic_0001>
module attributes {stable_mosaic.version = 11 : i64} {
  func.func @_video_mask_kernel(%arg0: i32, %arg1: memref<128x128xf32, #tpu.memory_space<vmem>>, %arg2: memref<2x256x256xf32, #tpu.memory_space<any>>, %arg3: memref<2x256x256xf32, #tpu.memory_space<any>>, %arg4: memref<1x1xf32, #tpu.memory_space<smem>>, %arg5: memref<128x128xf32, #tpu.memory_space<vmem>>, %arg6: memref<!tpu.dma_semaphore, #tpu.memory_space<semaphore_mem>>) attributes {dimension_semantics = [#tpu.dimension_semantics<arbitrary>], iteration_bounds = array<i64: 2>, scalar_prefetch = 0 : i64, scratch_operands = 2 : i64, tpu.core_type = #tpu.core_type<tc>, window_params = [{pipeline_mode = #tpu.pipeline_mode<synchronous>, transform_indices = @transform_0, window_bounds = array<i64: 128, 128>}, {}, {}, {transform_indices = @transform_3, window_bounds = array<i64: 1, 1>}]} {
    %c0_i32 = arith.constant 0 : i32
    %0 = arith.cmpi eq, %arg0, %c0_i32 : i32
    %1 = arith.extui %0 : i1 to i32
    %c0_i32_0 = arith.constant 0 : i32
    %2 = arith.cmpi ne, %1, %c0_i32_0 : i32
    scf.if %2 {
      %c0 = arith.constant 0 : index
      %c0_4 = arith.constant 0 : index
      %7 = vector.load %arg1[%c0, %c0_4] : memref<128x128xf32, #tpu.memory_space<vmem>>, vector<128x128xf32>
      %8 = arith.negf %7 : vector<128x128xf32>
      %9 = math.exp %8 : vector<128x128xf32>
      %cst = arith.constant 1.000000e+00 : f32
      %10 = vector.broadcast %cst : f32 to vector<128x128xf32>
      %11 = arith.addf %10, %9 : vector<128x128xf32>
      %12 = arith.divf %10, %11 : vector<128x128xf32>
      %13 = tpu.iota {dimensions = array<i32: 0>} : vector<128x128xi32>
      %14 = tpu.iota {dimensions = array<i32: 1>} : vector<128x128xi32>
      %15 = arith.cmpi eq, %13, %14 : vector<128x128xi32>
      %16 = arith.extui %15 : vector<128x128xi1> to vector<128x128xi32>
      %17 = arith.sitofp %16 : vector<128x128xi32> to vector<128x128xf32>
      %cst_5 = arith.constant 1.000000e+00 : f32
      %18 = vector.broadcast %cst_5 : f32 to vector<128x128xf32>
      %19 = arith.subf %18, %17 : vector<128x128xf32>
      %20 = arith.mulf %19, %12 : vector<128x128xf32>
      %21 = arith.addf %17, %20 : vector<128x128xf32>
      %c0_6 = arith.constant 0 : index
      %c0_7 = arith.constant 0 : index
      %22 = vector.load %arg5[%c0_6, %c0_7] : memref<128x128xf32, #tpu.memory_space<vmem>>, vector<128x128xf32>
      tpu.vector_store %arg5[%c0_6, %c0_7], %21 {strides = array<i32>} : memref<128x128xf32, #tpu.memory_space<vmem>>, vector<128x128xf32>,
      %23 = math.absf %20 : vector<128x128xf32>
      %24 = vector.shape_cast %23 : vector<128x128xf32> to vector<1x128x128xf32>
      %cst_8 = arith.constant dense<0.000000e+00> : vector<1xf32>
      %25 = vector.multi_reduction <add>, %24, %cst_8 [1, 2] : vector<1x128x128xf32> to vector<1xf32>
      %26 = vector.shape_cast %25 : vector<1xf32> to vector<1x1x1xf32>
      %27 = vector.extract %26[0, 0, 0] : f32 from vector<1x1x1xf32>
      %cst_9 = arith.constant 1.638400e+04 : f32
      %28 = arith.divf %27, %cst_9 : f32
      %c0_10 = arith.constant 0 : index
      %c0_11 = arith.constant 0 : index
      %29 = memref.load %arg4[%c0_10, %c0_11] : memref<1x1xf32, #tpu.memory_space<smem>>
      memref.store %28, %arg4[%c0_10, %c0_11] : memref<1x1xf32, #tpu.memory_space<smem>>
    } else {
    }
    %c128_i32 = arith.constant 128 : i32
    %c128_i32_1 = arith.constant 128 : i32
    %3 = tpu.memref_slice %arg3[%arg0, %c128_i32, %c128_i32_1] : memref<2x256x256xf32, #tpu.memory_space<any>> -> memref<1x128x128xf32, #tpu.memory_space<any>>
    %4 = tpu.memref_squeeze %3 : memref<1x128x128xf32, #tpu.memory_space<any>> -> memref<128x128xf32, #tpu.memory_space<any>>
    tpu.enqueue_dma source(%arg5 : memref<128x128xf32, #tpu.memory_space<vmem>>) target(%4 : memref<128x128xf32, #tpu.memory_space<any>>) target_semaphore(%arg6 : memref<!tpu.dma_semaphore, #tpu.memory_space<semaphore_mem>>)
    %c128_i32_2 = arith.constant 128 : i32
    %c128_i32_3 = arith.constant 128 : i32
    %5 = tpu.memref_slice %arg3[%arg0, %c128_i32_2, %c128_i32_3] : memref<2x256x256xf32, #tpu.memory_space<any>> -> memref<1x128x128xf32, #tpu.memory_space<any>>
    %6 = tpu.memref_squeeze %5 : memref<1x128x128xf32, #tpu.memory_space<any>> -> memref<128x128xf32, #tpu.memory_space<any>>
    tpu.wait_dma2 semaphore(%arg6 : memref<!tpu.dma_semaphore, #tpu.memory_space<semaphore_mem>>) src(%arg5 : memref<128x128xf32, #tpu.memory_space<vmem>>) dst(%6 : memref<128x128xf32, #tpu.memory_space<any>>)
    return
  }
  func.func @transform_0(%arg0: i32) -> (i32, i32) {
    %c0_i32 = arith.constant 0 : i32
    %c0_i32_0 = arith.constant 0 : i32
    %c0_i32_1 = arith.constant 0 : i32
    return %c0_i32, %c0_i32_0 : i32, i32
  }
  func.func @transform_3(%arg0: i32) -> (i32, i32) {
    %c0_i32 = arith.constant 0 : i32
    %c0_i32_0 = arith.constant 0 : i32
    %c0_i32_1 = arith.constant 0 : i32
    return %c0_i32, %c0_i32_0 : i32, i32
  }
}

</mosaic_0001>

<bundles_post_ra>
// kernel: tpu_custom_call.1
= control target key start
LH: loop header
LB: loop body
LE: loop exit
PB: predicated region body
PF: predicated region fallthrough
CT: control target
= control target key end

     0   :  { %9 = vsyncpa [#allocation5], 0  ;;  %s641_s12 = smov 0   ;;  %s947_s0 = inlined_call_operand.vmem [shape: f32[128,128], index: 0, kind: input, shape index: {}]   ;;  %s948_s1 = inlined_call_operand.hbm [shape: f32[2,256,256], index: 1, kind: input, shape index: {}, may-alias: {1,2}]   ;;  %s949_s2 = inlined_call_operand.hbm [shape: f32[2,256,256], index: 2, kind: output, shape index: {0}, may-alias: {1,2}]   ;;  %s950_s3 = inlined_call_operand.hbm [shape: f32[1,1], index: 3, kind: output, shape index: {1}]  }
   0x1 LB: > { %s647_s13 = sadd.s32 4294967295, %s613_s12   ;;  %p436_p0 = scmp.ge.s32.totalorder %s613_s12, 1  ;;  %s613_s12 = sphi %s641_s12, %s15_s12  }
   0x2   : > { %p76_p1 = scmp.lt.s32.totalorder %s613_s12, 3 }
   0x4   : > { %p77_p2 = pnand %p436_p0, %p76_p1 }
   0x5   : > { %p437_p3 = scmp.ne.s32.totalorder (!%p77_p2), %s647_s13, 0 }
   0x6   : > { %80 = sbr.rel (%p77_p2) target bundleno = 334 (0x14e), region = 24 }
   0xd   : > { %89 = sbr.rel (%p437_p3) target bundleno = 293 (0x125), region = 28  ;;  %v90_v0 = vld [vmem:[%s947_s0] sm:$0xff] (!%p437_p3)  ;;  %v91_v1 = vld [vmem:[%s947_s0 + $0x8] sm:$0xff] (!%p437_p3)  ;;  %v92_v2 = vld [vmem:[%s947_s0 + $0x10] sm:$0xff] (!%p437_p3)  ;;  %v202_v3 = vlaneseq (!%p437_p3) }
   0xe   : > { %v93_v4 = vld [vmem:[%s947_s0 + $0x18] sm:$0xff] (!%p437_p3)  ;;  %v438_v5 = vmul.f32 (!%p437_p3), -1.442695, %v90_v0  ;;  %v94_v6 = vld [vmem:[%s947_s0 + $0x20] sm:$0xff] (!%p437_p3)  ;;  %v95_v7 = vld [vmem:[%s947_s0 + $0x28] sm:$0xff] (!%p437_p3) }
   0xf   : > { %v439_v8 = vmul.f32 (!%p437_p3), -1.442695, %v91_v1  ;;  %v96_v9 = vld [vmem:[%s947_s0 + $0x30] sm:$0xff] (!%p437_p3)  ;;  %v97_v10 = vld [vmem:[%s947_s0 + $0x38] sm:$0xff] (!%p437_p3)  ;;  %v440_v11 = vmul.f32 (!%p437_p3), -1.442695, %v92_v2 }
  0x10   : > { %500 = vpow2.f32 (!%p437_p3), %v438_v5  ;;  %v676_v12 = vshrl.u32 (!%p437_p3), %v202_v3, 7  ;;  %v98_v13 = vld [vmem:[%s947_s0 + $0x40] sm:$0xff] (!%p437_p3)  ;;  %v99_v14 = vld [vmem:[%s947_s0 + $0x48] sm:$0xff] (!%p437_p3)  ;;  %v441_v15 = vmul.f32 (!%p437_p3), -1.442695, %v93_v4  ;;  %v100_v16 = vld [vmem:[%s947_s0 + $0x50] sm:$0xff] (!%p437_p3) }
  0x11   : > { %502 = vpow2.f32 (!%p437_p3), %v439_v8  ;;  %v101_v17 = vld [vmem:[%s947_s0 + $0x58] sm:$0xff] (!%p437_p3)  ;;  %v442_v18 = vmul.f32 (!%p437_p3), -1.442695, %v94_v6  ;;  %v443_v19 = vmul.f32 (!%p437_p3), -1.442695, %v95_v7  ;;  %v102_v20 = vld [vmem:[%s947_s0 + $0x60] sm:$0xff] (!%p437_p3) }
  0x12   : > { %504 = vpow2.f32 (!%p437_p3), %v440_v11  ;;  %v103_v21 = vld [vmem:[%s947_s0 + $0x68] sm:$0xff] (!%p437_p3)  ;;  %v444_v22 = vmul.f32 (!%p437_p3), -1.442695, %v96_v9  ;;  %v445_v23 = vmul.f32 (!%p437_p3), -1.442695, %v97_v10  ;;  %v104_v24 = vld [vmem:[%s947_s0 + $0x70] sm:$0xff] (!%p437_p3) }
  0x13   : > { %506 = vpow2.f32 (!%p437_p3), %v441_v15  ;;  %v105_v25 = vld [vmem:[%s947_s0 + $0x78] sm:$0xff] (!%p437_p3)  ;;  %v446_v26 = vmul.f32 (!%p437_p3), -1.442695, %v98_v13  ;;  %v703_v27 = vadd.s32 (!%p437_p3), 8, %v676_v12  ;;  %v705_v28 = vand.u32 (!%p437_p3), 127, %v202_v3 }
  0x14   : > { %508 = vpow2.f32 %v442_v18  ;;  %v447_v29 = vmul.f32 -1.442695, %v99_v14  ;;  %v448_v30 = vmul.f32 -1.442695, %v100_v16  ;;  %v708_v31 = vadd.s32 16, %v676_v12 }
  0x15   : > { %510 = vpow2.f32 %v443_v19  ;;  %v449_v32 = vmul.f32 -1.442695, %v101_v17  ;;  %v450_v33 = vmul.f32 -1.442695, %v102_v20  ;;  %v451_v34 = vmul.f32 -1.442695, %v103_v21 }
  0x16   : > { %512 = vpow2.f32 %v444_v22  ;;  %v452_v35 = vmul.f32 -1.442695, %v104_v24  ;;  %v453_v36 = vmul.f32 -1.442695, %v105_v25  ;;  %v711_v37 = vadd.s32 24, %v676_v12 }
  0x17   : > { %514 = vpow2.f32 %v445_v23  ;;  %v714_v38 = vadd.s32 32, %v676_v12  ;;  %v717_v39 = vadd.s32 40, %v676_v12  ;;  %v720_v40 = vadd.s32 48, %v676_v12 }
  0x18   : > { %516 = vpow2.f32 %v446_v26  ;;  %v723_v41 = vadd.s32 56, %v676_v12  ;;  %v726_v42 = vadd.s32 64, %v676_v12  ;;  %v729_v43 = vadd.s32 72, %v676_v12 }
  0x19   : > { %518 = vpow2.f32 %v447_v29  ;;  %v732_v45 = vadd.s32 80, %v676_v12  ;;  %v735_v46 = vadd.s32 88, %v676_v12  ;;  %v738_v47 = vadd.s32 96, %v676_v12 }
  0x1a   : > { %v501_v44 = vpop.eup %500  ;;  %520 = vpow2.f32 %v448_v30  ;;  %v741_v49 = vadd.s32 104, %v676_v12  ;;  %v744_v50 = vadd.s32 112, %v676_v12  ;;  %v747_v51 = vadd.s32 120, %v676_v12 }
  0x1b   : > { %v503_v48 = vpop.eup %502  ;;  %522 = vpow2.f32 %v449_v32  ;;  %v154_v53 = vadd.f32 1.0, %v501_v44  ;;  %vm221_vm0 = vcmp.eq.s32.totalorder %v676_v12, %v705_v28  ;;  %vm222_vm1 = vcmp.eq.s32.totalorder %v703_v27, %v705_v28 }
  0x1c   : > { %v505_v52 = vpop.eup %504  ;;  %524 = vpow2.f32 %v450_v33  ;;  %v155_v55 = vadd.f32 1.0, %v503_v48  ;;  %vm223_vm2 = vcmp.eq.s32.totalorder %v708_v31, %v705_v28  ;;  %vm224_vm3 = vcmp.eq.s32.totalorder %v711_v37, %v705_v28 }
  0x1d   : > { %v507_v54 = vpop.eup %506  ;;  %526 = vpow2.f32 %v451_v34  ;;  %v156_v57 = vadd.f32 1.0, %v505_v52  ;;  %vm225_vm4 = vcmp.eq.s32.totalorder %v714_v38, %v705_v28  ;;  %vm226_vm5 = vcmp.eq.s32.totalorder %v717_v39, %v705_v28 }
  0x1e   : > { %v509_v56 = vpop.eup %508  ;;  %528 = vpow2.f32 %v452_v35  ;;  %v157_v59 = vadd.f32 1.0, %v507_v54  ;;  %vm227_vm6 = vcmp.eq.s32.totalorder %v720_v40, %v705_v28  ;;  %vm228_vm7 = vcmp.eq.s32.totalorder %v723_v41, %v705_v28 }
  0x1f   : > { %v511_v58 = vpop.eup %510  ;;  %530 = vpow2.f32 %v453_v36  ;;  %v158_v61 = vadd.f32 1.0, %v509_v56  ;;  %vm229_vm8 = vcmp.eq.s32.totalorder %v726_v42, %v705_v28  ;;  %vm230_vm9 = vcmp.eq.s32.totalorder %v729_v43, %v705_v28 }
  0x20   : > { %v513_v60 = vpop.eup %512  ;;  %532 = vrcp.f32 %v154_v53  ;;  %v159_v63 = vadd.f32 1.0, %v511_v58  ;;  %vm231_vm10 = vcmp.eq.s32.totalorder %v732_v45, %v705_v28  ;;  %vm232_vm11 = vcmp.eq.s32.totalorder %v735_v46, %v705_v28 }
  0x21   : > { %v515_v62 = vpop.eup %514  ;;  %534 = vrcp.f32 %v155_v55  ;;  %v160_v1 = vadd.f32 1.0, %v513_v60  ;;  %vm233_vm12 = vcmp.eq.s32.totalorder %v738_v47, %v705_v28  ;;  %vm234_vm13 = vcmp.eq.s32.totalorder %v741_v49, %v705_v28 }
  0x22   : > { %v517_v0 = vpop.eup %516  ;;  %536 = vrcp.f32 %v156_v57  ;;  %v161_v3 = vadd.f32 1.0, %v515_v62  ;;  %vm235_vm14 = vcmp.eq.s32.totalorder %v744_v50, %v705_v28  ;;  %vm236_vm15 = vcmp.eq.s32.totalorder %v747_v51, %v705_v28 }
  0x23   : > { %v519_v2 = vpop.eup %518  ;;  %538 = vrcp.f32 %v157_v59  ;;  %v162_v5 = vadd.f32 1.0, %v517_v0  ;;  %v615_v6 = vmov 0.0  }
  0x24   : > { %v521_v4 = vpop.eup %520  ;;  %540 = vrcp.f32 %v158_v61  ;;  %v784_v7 = vsel %vm221_vm0, 1.0, %v615_v6  ;;  %v789_v8 = vsel %vm222_vm1, 1.0, %v615_v6  ;;  %v163_v10 = vadd.f32 1.0, %v519_v2 }
  0x25   : > { %v523_v9 = vpop.eup %522  ;;  %542 = vrcp.f32 %v159_v63  ;;  %v794_v11 = vsel %vm223_vm2, 1.0, %v615_v6  ;;  %v799_v13 = vsel %vm224_vm3, 1.0, %v615_v6  ;;  %v164_v14 = vadd.f32 1.0, %v521_v4 }
  0x26   : > { %v525_v12 = vpop.eup %524  ;;  %544 = vrcp.f32 %v160_v1  ;;  %v804_v15 = vsel %vm225_vm4, 1.0, %v615_v6  ;;  %v809_v16 = vsel %vm226_vm5, 1.0, %v615_v6  ;;  %v165_v18 = vadd.f32 1.0, %v523_v9 }
  0x27   : > { %v527_v17 = vpop.eup %526  ;;  %546 = vrcp.f32 %v161_v3  ;;  %v814_v19 = vsel %vm227_vm6, 1.0, %v615_v6  ;;  %v819_v20 = vsel %vm228_vm7, 1.0, %v615_v6  ;;  %v166_v22 = vadd.f32 1.0, %v525_v12 }
  0x28   : > { %v529_v21 = vpop.eup %528  ;;  %548 = vrcp.f32 %v162_v5  ;;  %v824_v23 = vsel %vm229_vm8, 1.0, %v615_v6  ;;  %v829_v24 = vsel %vm230_vm9, 1.0, %v615_v6  ;;  %v167_v26 = vadd.f32 1.0, %v527_v17 }
  0x29   : > { %v531_v25 = vpop.eup %530  ;;  %550 = vrcp.f32 %v163_v10  ;;  %v834_v27 = vsel %vm231_vm10, 1.0, %v615_v6  ;;  %v839_v29 = vsel %vm232_vm11, 1.0, %v615_v6  ;;  %v168_v31 = vadd.f32 1.0, %v529_v21 }
  0x2a   : > { %v533_v30 = vpop.eup %532  ;;  %552 = vrcp.f32 %v164_v14  ;;  %v844_v32 = vsel %vm233_vm12, 1.0, %v615_v6  ;;  %v849_v33 = vsel %vm234_vm13, 1.0, %v615_v6  ;;  %v169_v35 = vadd.f32 1.0, %v531_v25 }
  0x2b   : > { %v535_v34 = vpop.eup %534  ;;  %554 = vrcp.f32 %v165_v18  ;;  %v854_v36 = vsel %vm235_vm14, 1.0, %v615_v6  ;;  %v269_v37 = vsub.f32 1.0, %v784_v7  ;;  %v270_v39 = vsub.f32 1.0, %v789_v8 }
  0x2c   : > { %v537_v38 = vpop.eup %536  ;;  %556 = vrcp.f32 %v166_v22  ;;  %v271_v40 = vsub.f32 1.0, %v794_v11  ;;  %v272_v41 = vsub.f32 1.0, %v799_v13  ;;  %v273_v43 = vsub.f32 1.0, %v804_v15 }
  0x2d   : > { %v539_v42 = vpop.eup %538  ;;  %558 = vrcp.f32 %v167_v26  ;;  %v274_v44 = vsub.f32 1.0, %v809_v16  ;;  %v275_v45 = vsub.f32 1.0, %v814_v19  ;;  %v866_v47 = vsel %vm236_vm15, 1.0, %v615_v6 }
  0x2e   : > { %v541_v46 = vpop.eup %540  ;;  %560 = vrcp.f32 %v168_v31  ;;  %v276_v48 = vsub.f32 1.0, %v819_v20  ;;  %v277_v49 = vsub.f32 1.0, %v824_v23  ;;  %v278_v52 = vsub.f32 1.0, %v829_v24 }
  0x2f   : > { %v543_v50 = vpop.eup %542  ;;  %562 = vrcp.f32 %v169_v35  ;;  %v279_v53 = vsub.f32 1.0, %v834_v27  ;;  %v280_v54 = vsub.f32 1.0, %v839_v29  ;;  %v281_v56 = vsub.f32 1.0, %v844_v32 }
  0x30   : > { %v545_v55 = vpop.eup %544  ;;  %v285_v57 = vmul.f32 %v533_v30, %v269_v37  ;;  %v286_v58 = vmul.f32 %v535_v34, %v270_v39  ;;  %v874_v28 = vmul.f32 %v537_v38, %v271_v40  ;;  %v876_v59 = vmul.f32 %v539_v42, %v272_v41 }
  0x31   : > { %v547_v51 = vpop.eup %546  ;;  %v878_v60 = vmul.f32 %v541_v46, %v273_v43  ;;  %v880_v61 = vmul.f32 %v543_v50, %v274_v44  ;;  %v882_v62 = vmul.f32 %v545_v55, %v275_v45  ;;  %v283_v17 = vsub.f32 1.0, %v854_v36 }
  0x32   : > { %v549_v63 = vpop.eup %548  ;;  %v884_v0 = vmul.f32 %v547_v51, %v276_v48  ;;  %v301_v1 = vadd.f32 %v784_v7, %v285_v57  ;;  %v302_v2 = vadd.f32 %v789_v8, %v286_v58  ;;  %v303_v3 = vadd.f32 %v794_v11, %v874_v28 }
  0x33   : > { %v551_v4 = vpop.eup %550  ;;  %v890_v5 = vmul.f32 %v549_v63, %v277_v49  ;;  %v304_v6 = vadd.f32 %v799_v13, %v876_v59  ;;  %v305_v9 = vadd.f32 %v804_v15, %v878_v60  ;;  %v306_v10 = vadd.f32 %v809_v16, %v880_v61 }
  0x34   : > { %v553_v12 = vpop.eup %552  ;;  %v282_v7 = vsub.f32 1.0, %v849_v33  ;;  %v294_v14 = vmul.f32 %v551_v4, %v278_v52  ;;  %v307_v8 = vadd.f32 %v814_v19, %v882_v62  ;;  %v308_v11 = vadd.f32 %v819_v20, %v884_v0  ;;  %317 = vst [vmem:[#allocation2] sm:$0xff] %v301_v1  ;;  %318 = vst [vmem:[#allocation2 + $0x8] sm:$0xff] %v302_v2 }
  0x35   : > { %319 = vst [vmem:[#allocation2 + $0x10] sm:$0xff] %v303_v3  ;;  %v555_v13 = vpop.eup %554  ;;  %v295_v15 = vmul.f32 %v553_v12, %v279_v53  ;;  %v309_v16 = vadd.f32 %v824_v23, %v890_v5  ;;  %320 = vst [vmem:[#allocation2 + $0x18] sm:$0xff] %v304_v6  ;;  %v284_v21 = vsub.f32 1.0, %v866_v47  ;;  %v333_v30 = vand.u32 2147483647, %v285_v57 }
  0x36   : > { %321 = vst [vmem:[#allocation2 + $0x20] sm:$0xff] %v305_v9  ;;  %322 = vst [vmem:[#allocation2 + $0x28] sm:$0xff] %v306_v10  ;;  %v557_v18 = vpop.eup %556  ;;  %v296_v19 = vmul.f32 %v555_v13, %v280_v54  ;;  %v310_v22 = vadd.f32 %v829_v24, %v294_v14  ;;  %v334_v31 = vand.u32 2147483647, %v286_v58  ;;  %v335_v24 = vand.u32 2147483647, %v874_v28 }
  0x37   : > { %323 = vst [vmem:[#allocation2 + $0x30] sm:$0xff] %v307_v8  ;;  %324 = vst [vmem:[#allocation2 + $0x38] sm:$0xff] %v308_v11  ;;  %v559_v20 = vpop.eup %558  ;;  %v297_v25 = vmul.f32 %v557_v18, %v281_v56  ;;  %v311_v26 = vadd.f32 %v834_v27, %v295_v15  ;;  %v336_v42 = vand.u32 2147483647, %v876_v59  ;;  %v337_v44 = vand.u32 2147483647, %v878_v60 }
  0x38   : > { %325 = vst [vmem:[#allocation2 + $0x40] sm:$0xff] %v309_v16  ;;  %v561_v34 = vpop.eup %560  ;;  %v298_v23 = vmul.f32 %v559_v20, %v282_v7  ;;  %v312_v35 = vadd.f32 %v839_v29, %v296_v19  ;;  %326 = vst [vmem:[#allocation2 + $0x48] sm:$0xff] %v310_v22  ;;  %v349_v43 = vadd.f32 %v334_v31, %v333_v30  ;;  %v338_v45 = vand.u32 2147483647, %v880_v61 }
  0x39   : > { %v563_v37 = vpop.eup %562  ;;  %v299_v38 = vmul.f32 %v561_v34, %v283_v17  ;;  %v313_v39 = vadd.f32 %v844_v32, %v297_v25  ;;  %327 = vst [vmem:[#allocation2 + $0x50] sm:$0xff] %v311_v26  ;;  %v341_v50 = vand.u32 2147483647, %v890_v5  ;;  %v342_v53 = vand.u32 2147483647, %v294_v14 }
  0x3a   : > { %v300_v40 = vmul.f32 %v563_v37, %v284_v21  ;;  %v314_v41 = vadd.f32 %v849_v33, %v298_v23  ;;  %328 = vst [vmem:[#allocation2 + $0x58] sm:$0xff] %v312_v35  ;;  %v350_v32 = vadd.f32 %v349_v43, %v335_v24  ;;  %v339_v33 = vand.u32 2147483647, %v882_v62 }
  0x3b   : > { %v315_v27 = vadd.f32 %v854_v36, %v299_v38  ;;  %329 = vst [vmem:[#allocation2 + $0x60] sm:$0xff] %v313_v39  ;;  %v340_v36 = vand.u32 2147483647, %v884_v0  ;;  %v343_v54 = vand.u32 2147483647, %v295_v15 }
  0x3c   : > { %v316_v29 = vadd.f32 %v866_v47, %v300_v40  ;;  %330 = vst [vmem:[#allocation2 + $0x68] sm:$0xff] %v314_v41  ;;  %v351_v46 = vadd.f32 %v350_v32, %v336_v42  ;;  %v344_v56 = vand.u32 2147483647, %v296_v19  ;;  %v345_v58 = vand.u32 2147483647, %v297_v25 }
  0x3d   : > { %331 = vst [vmem:[#allocation2 + $0x70] sm:$0xff] %v315_v27  ;;  %v346_v51 = vand.u32 2147483647, %v298_v23  ;;  %v347_v60 = vand.u32 2147483647, %v299_v38 }
  0x3e   : > { %332 = vst [vmem:[#allocation2 + $0x78] sm:$0xff] %v316_v29  ;;  %v352_v48 = vadd.f32 %v351_v46, %v337_v44  ;;  %v348_v62 = vand.u32 2147483647, %v300_v40 }
  0x40   : > { %v353_v49 = vadd.f32 %v352_v48, %v338_v45 }
  0x42   : > { %v354_v52 = vadd.f32 %v353_v49, %v339_v33 }
  0x44   : > { %v355_v47 = vadd.f32 %v354_v52, %v340_v36 }
  0x46   : > { %v356_v55 = vadd.f32 %v355_v47, %v341_v50 }
  0x48   : > { %v357_v57 = vadd.f32 %v356_v55, %v342_v53 }
  0x4a   : > { %v358_v28 = vadd.f32 %v357_v57, %v343_v54 }
  0x4c   : > { %v359_v59 = vadd.f32 %v358_v28, %v344_v56 }
  0x4e   : > { %v360_v61 = vadd.f32 %v359_v59, %v345_v58 }
  0x50   : > { %v361_v63 = vadd.f32 %v360_v61, %v346_v51 }
  0x52   : > { %v362_v1 = vadd.f32 %v361_v63, %v347_v60 }
  0x54   : > { %v363_v0 = vadd.f32 %v362_v1, %v348_v62 }
  0x56   : > { %364 = vadd.xlane.f32.xlu0 %v363_v0 }
  0xe3   : > { %v365_v2 = vpop.xlane.xlu0 %364 }
  0xe4   : > { %v366_v3 = vrot.slane %v365_v2, 4 }
  0xe6   : > { %v367_v4 = vadd.f32 %v366_v3, %v365_v2 }
  0xe8   : > { %v368_v5 = vrot.slane %v367_v4, 2 }
  0xea   : > { %v369_v6 = vadd.f32 %v368_v5, %v367_v4 }
  0xec   : > { %v370_v9 = vrot.slane %v369_v6, 1 }
  0xee   : > { %v371_v10 = vadd.f32 %v370_v9, %v369_v6 }
  0xf0   : > { %478 = vpush %v371_v10 }
 0x121   : > { %s479_s19 = spop %478 }
 0x122   : > { %s375_s20 = smul.f32 6.1035156e-05, %s479_s19 }
 0x124   : > { %377 = sst [smem:[#allocation4]] %s375_s20 }
 0x125 PF: > { %s477_s21 = sshll.u32 %s647_s13, 13  ;;  %s616_s25 = smov [#allocation2]  }
 0x126   : > { %s421_s24 = scalar_lea.hbm %s949_s2, %s477_s21  ;;  %s383_s26 = sshll.u32 %s616_s25, 4  ;;  %s384_s26 = int_to_ptr.vmem [resolvable:$true] %s383_s26 }
 0x127   : > { %s422_s27 = scalar_lea.hbm %s421_s24, 4224  ;;  %s564_s28 = scalar_lea.vmem %s384_s26, 2048 }
 0x128   : > { %p565_p4 = scmp.ne.s32.totalorder %s384_s26, %s564_s28  ;;  %p569_p5 = scmp.lt.s32.totalorder %s384_s26, %s384_s26 }
 0x129   : > { %p570_p6 = scmp.lt.s32.totalorder %s564_s28, %s564_s28 }
 0x12b   : > { %p571_p7 = por %p570_p6, %p569_p5 }
 0x12d   : > { %p572_p8 = pnand %p571_p7, %p565_p4 }
 0x12f   : > { %575 = shalt.err (!%p572_p8)  }
 0x130   : > { %s588_s29 = scalar_lea.hbm %s421_s24, 6272  ;;  %s578_s5 = scalar_lea.hbm %s949_s2, 16384 }
 0x131   : > { %p577_p9 = scmp.ne.s32.totalorder %s422_s27, %s588_s29  ;;  %p579_p10 = scmp.lt.u32.totalorder %s422_s27, %s949_s2 }
 0x132   : > { %p580_p11 = scmp.lt.u32.totalorder %s578_s5, %s588_s29  ;;  %p582_p13 = scmp.lt.u32.totalorder %s588_s29, %s422_s27 }
 0x134   : > { %p581_p12 = por %p580_p11, %p579_p10 }
 0x136   : > { %p583_p0 = por %p582_p13, %p581_p12 }
 0x138   : > { %p584_p1 = pnand %p583_p0, %p577_p9 }
 0x13a   : > { %587 = shalt.err (!%p584_p1)  }
 0x13b   : > { %s617_s8 = smov 128   ;;  %s618_s9 = smov 256  }
 0x13c   : > { %s619_s10 = smov 8  }
 0x13d   : > { %386 = dma.vmem_to_hbm [thread:$0]  %s384_s26, 2048, %s422_s27, [#allocation3], %s617_s8, %s618_s9, %s619_s10 }
 0x13e   : > { %605 = dma.done.wait [#allocation3], 2048 }
 0x13f   : > { %606 = vsyncadd [#allocation3], 4294965248  ;;  %p484_p2 = scmp.eq.s32.totalorder %s647_s13, 1  ;;  %s589_s14 = scalar_lea.hbm %s950_s3, 16 }
 0x140   : > { %p590_p3 = scmp.ne.s32.totalorder %s950_s3, %s589_s14  ;;  %p595_p6 = scmp.lt.u32.totalorder %s589_s14, %s950_s3 }
 0x142   : > { %p591_p4 = pnand %p590_p3, %p484_p2 }
 0x144   : > { %p592_p5 = pneg %p591_p4 }
 0x146   : > { %p597_p7 = pnand %p595_p6, %p592_p5 }
 0x148   : > { %600 = shalt.err (!%p597_p7)
}
 0x149   : > { %s620_s19 = smov [#allocation4]  }
 0x14a   : > { %481 = dma.smem_to_hbm (%p484_p2), %s620_s19, 16, %s950_s3, [#allocation5]  }
 0x14b   : > { %608 = dma.done.wait (%p484_p2), [#allocation5], 16  }
 0x14c   : > { %610 = vsyncadd (%p484_p2), [#allocation5], 4294967280 }
 0x14d   : > { %404 = sfence }
 0x14e PF: > { %s15_s12 = sadd.s32 1, %s613_s12  }
 0x14f   : > { %p12_p8 = scmp.ge.s32.totalorder %s15_s12, 4  }
 0x151   :  { %14 = sbr.rel (!%p12_p8) target bundleno = 1 (0x1), region = 54 }
 0x158   :  { %410 = vsyncpa [#allocation5], 1 }
 0x159   :  { %412 = vsyncpa [#allocation5 + $0x1], 1 }
 0x15a   :  { %413 = vsyncmov [#allocation3] }
 0x15d   :  { %s414_s13 = vpop.sfrf %413 }
 0x15e   :  { %p476_p9 = scmp.ne.s32.totalorder %s414_s13, 0 }
 0x160   :  { %418 = shalt.err (%p476_p9)  }

</bundles_post_ra>
